<compile_context>
chip_gen: v7x
topology: tpu7x:2x2x1
jax: 0.10.0
libtpu: 0.0.40
codegen_flags: <defaults>
</compile_context>

<pallas_src>
import jax
import jax.numpy as jnp
import numpy as np
from jax.experimental import pallas as pl
from jax.experimental.pallas import tpu as pltpu

_INV_SQRT2 = 0.7071067811865476
_LN_EPS = 1e-5  # torch.nn.LayerNorm default


def _round_up(x, m):
    return ((x + m - 1) // m) * m


def _attn_pool_kernel(x_ref, mask_ref, w1_ref, b1_ref, gamma_ref, beta_ref,
                      w2_ref, b2_ref, out_ref):
    """Process one batch tile.

    x_ref:  [bb, S, D] f32      mask_ref: [bb, S] int32     out_ref: [bb, D]
    w1_ref: [D, D] bf16         b1/gamma/beta/w2_ref: [1, D] f32
    b2_ref: [1] f32 in SMEM
    """
    bb, S, D = x_ref.shape

    # Weight/bias reads hoisted once per grid step (resident across the grid).
    w1 = w1_ref[...]                                  # bf16 [D, D]
    b1 = b1_ref[...]
    gamma = gamma_ref[...]
    beta = beta_ref[...]
    w2_row = w2_ref[...]                              # [1, D]
    b2 = b2_ref[0]                                    # scalar from SMEM

    # ---- Linear(D, D) on the MXU in bf16, f32 accumulation. ----------------
    # One large-M matmul for the whole tile (M = bb*S rows); S % 8 == 0 is
    # guaranteed by the wrapper so the reshape is a free major-dim collapse.
    xb = x_ref[...].astype(jnp.bfloat16)              # bf16 copy for the MXU
    x2 = xb.reshape(bb * S, D)
    h = jnp.dot(x2, w1, preferred_element_type=jnp.float32) + b1   # [bb*S, D] f32

    # ---- LayerNorm(D) (f32 statistics) --------------------------------------
    mu = jnp.mean(h, axis=-1, keepdims=True)
    var = jnp.mean(jnp.square(h - mu), axis=-1, keepdims=True)
    hn = (h - mu) * jax.lax.rsqrt(var + _LN_EPS) * gamma + beta

    # ---- GELU (exact / erf-based, matching torch.nn.GELU() default) ---------
    hg = 0.5 * hn * (1.0 + jax.lax.erf(hn * _INV_SQRT2))

    # ---- Linear(D, 1): lane-dense logits [bb, 1, S] --------------------------
    hg3 = hg.reshape(bb, S, D)                         # free (S % 8 == 0)
    w2b = jnp.broadcast_to(w2_row, (bb, 1, D))
    logits = jnp.einsum('bqd,bkd->bqk', w2b, hg3,
                        preferred_element_type=jnp.float32) + b2   # [bb, 1, S]

    # ---- Mask + softmax over the sequence axis (full lane width) ------------
    # A fully-masked row produces NaN, identical to the PyTorch module.
    mask3 = mask_ref[...][:, None, :]                  # [bb, 1, S]
    logits = jnp.where(mask3 == 0, -jnp.inf, logits)
    m = jnp.max(logits, axis=-1, keepdims=True)
    e = jnp.exp(logits - m)
    wsm = e / jnp.sum(e, axis=-1, keepdims=True)       # [bb, 1, S] f32

    # ---- Weighted sum over seq; re-read x here to keep its live range short.
    x3 = x_ref[...]                                    # f32 [bb, S, D]
    out = jnp.einsum('bqs,bsd->bqd', wsm, x3,
                     preferred_element_type=jnp.float32)            # [bb, 1, D]
    out_ref[...] = out[:, 0, :].astype(out_ref.dtype)  # lane-dense [bb, D] store


def _vmem_budget_bytes():
    """VMEM budget for this kernel, derived from the actual chip when possible.
    Fallback assumes v7x's 64 MiB (the tightest of the supported generations)."""
    cap = 64 * (1 << 20)
    try:
        info = pltpu.get_tpu_info()
        cap = int(getattr(info, "vmem_capacity_bytes", cap))
    except Exception:
        pass
    return min((cap * 3) // 4, 100 * (1 << 20))   # ~48 MiB on v7x, ~96 MiB v5e/v6e


def _pick_block_b(B, S_pad, D, vmem_budget):
    """Batch tile size (multiple of 8, = output block sublane dim).

    Sized to fill the VMEM budget (big fused-matmul M, amortized per-step
    overhead), while keeping at least 2 grid steps when the batch allows so
    both v7x TensorCores have work and DMA overlaps compute."""
    B8 = _round_up(B, 8)
    # Per batch row live per step: 2x double-buffered f32 x tile + bf16 copy +
    # ~3 f32 [S, D] intermediates (h / hn / hg).  Conservative.
    per_row = 6 * S_pad * D * 4
    fixed = 2 * D * D * 2 + (2 << 20)            # bf16 w1 (x2 buffers) + slack
    avail = max(vmem_budget - fixed, per_row * 8)
    bb = max(int(avail // per_row), 8)
    if B8 >= 16:
        bb = min(bb, B8 // 2)                    # keep >= 2 grid steps (megacore)
    bb = min(bb, B8)
    bb = max((bb // 8) * 8, 8)
    return bb


def attention_pooling(last_hidden_state, attention_mask, params, *, block_b=None):
    """Pallas wrapper. last_hidden_state [B,S,D] f32, attention_mask [B,S]."""
    B, S, D = last_hidden_state.shape
    w1, b1, gamma, beta, w2_row, b2 = params

    x = last_hidden_state.astype(jnp.float32)
    mask = attention_mask.astype(jnp.int32)
    w1_bf = w1.astype(jnp.bfloat16)          # half-size VMEM-resident MXU operand

    S_pad = _round_up(S, 8)                  # keeps in-kernel reshapes relayout-free
    vmem_budget = _vmem_budget_bytes()
    if block_b is None:
        block_b = _pick_block_b(B, S_pad, D, vmem_budget)
    assert block_b % 8 == 0, block_b
    B_pad = _round_up(B, block_b)
    nb = B_pad // block_b

    if S_pad != S:
        # Pad positions are masked out (mask=0 -> softmax weight 0).
        x = jnp.pad(x, ((0, 0), (0, S_pad - S), (0, 0)))
        mask = jnp.pad(mask, ((0, 0), (0, S_pad - S)))
    if B_pad != B:
        # Pad batch rows get mask=1 so they stay finite; sliced off below.
        x = jnp.pad(x, ((0, B_pad - B), (0, 0), (0, 0)))
        mask = jnp.pad(mask, ((0, B_pad - B), (0, 0)), constant_values=1)

    grid_spec = pltpu.PrefetchScalarGridSpec(
        num_scalar_prefetch=0,
        grid=(nb,),
        in_specs=[
            pl.BlockSpec((block_b, S_pad, D), lambda i: (i, 0, 0)),  # x (streamed)
            pl.BlockSpec((block_b, S_pad), lambda i: (i, 0)),        # mask [B,S]
            pl.BlockSpec((D, D), lambda i: (0, 0)),                  # w1 bf16 (resident)
            pl.BlockSpec((1, D), lambda i: (0, 0)),                  # b1
            pl.BlockSpec((1, D), lambda i: (0, 0)),                  # gamma
            pl.BlockSpec((1, D), lambda i: (0, 0)),                  # beta
            pl.BlockSpec((1, D), lambda i: (0, 0)),                  # w2 row
            pl.BlockSpec(memory_space=pltpu.MemorySpace.SMEM),       # b2 scalar
        ],
        out_specs=pl.BlockSpec((block_b, D), lambda i: (i, 0)),
    )

    cost = pl.CostEstimate(
        flops=2 * B_pad * S_pad * D * D + 4 * B_pad * S_pad * D,
        transcendentals=B_pad * S_pad * (D + 2),
        bytes_accessed=(B_pad * S_pad * D * 4      # x
                        + B_pad * S_pad * 4        # mask
                        + D * D * 2 + 4 * D * 4    # params
                        + B_pad * D * 4),          # out
    )

    out = pl.pallas_call(
        _attn_pool_kernel,
        out_shape=jax.ShapeDtypeStruct((B_pad, D), jnp.float32),
        grid_spec=grid_spec,
        compiler_params=pltpu.CompilerParams(
            # batch tiles are independent -> megacore sharding on v7x,
            # harmless on v5e/v6e.
            dimension_semantics=("parallel",),
            vmem_limit_bytes=vmem_budget),
        cost_estimate=cost,
    )(x, mask, w1_bf, b1, gamma, beta, w2_row, b2)
    return out[:B]


def init_params(key, in_dim):
    """Deterministic synthetic params matching nn.Linear/LayerNorm shapes.

    Linear 1 weight is stored pre-transposed ([in, out]); Linear 2 weight is
    stored as a [1, in] row; its bias is a [1] scalar (lives in SMEM)."""
    k1, k2, k3, k4 = jax.random.split(key, 4)
    bound = 1.0 / float(np.sqrt(in_dim))
    w1 = jax.random.uniform(k1, (in_dim, in_dim), jnp.float32, -bound, bound)
    b1 = jax.random.uniform(k2, (1, in_dim), jnp.float32, -bound, bound)
    gamma = jnp.ones((1, in_dim), jnp.float32)   # LayerNorm weight
    beta = jnp.zeros((1, in_dim), jnp.float32)   # LayerNorm bias
    w2_row = jax.random.uniform(k3, (1, in_dim), jnp.float32, -bound, bound)
    b2 = jax.random.uniform(k4, (1,), jnp.float32, -bound, bound)
    return w1, b1, gamma, beta, w2_row, b2


def _reference(last_hidden_state, attention_mask, params):
    """Plain-JAX (f32) reference of the PyTorch forward for verification."""
    w1, b1, gamma, beta, w2_row, b2 = params
    h = last_hidden_state @ w1 + b1[0]
    mu = jnp.mean(h, axis=-1, keepdims=True)
    var = jnp.mean(jnp.square(h - mu), axis=-1, keepdims=True)
    hn = (h - mu) / jnp.sqrt(var + _LN_EPS) * gamma[0] + beta[0]
    hg = jax.nn.gelu(hn, approximate=False)
    logits = hg @ w2_row[0][:, None] + b2[0]                     # [B, S, 1]
    logits = jnp.where(attention_mask[:, :, None] == 0, -jnp.inf, logits)
    w = jax.nn.softmax(logits, axis=1)
    return jnp.sum(w * last_hidden_state, axis=1)


if __name__ == "__main__":
    B, S, D = 2, 8, 32
    key = jax.random.PRNGKey(0)
    kx, kp = jax.random.split(key)

    x = jax.random.normal(kx, (B, S, D), dtype=jnp.float32)
    attention_mask = jnp.array(
        [[1, 1, 1, 1, 1, 0, 0, 0],
         [1, 1, 1, 1, 1, 1, 1, 1]], dtype=jnp.int32)
    params = init_params(kp, D)

    out = attention_pooling(x, attention_mask, params)
    out = jax.block_until_ready(out)

    ref = _reference(x, attention_mask, params)
    # bf16 MXU operands loosen the old 1e-5 tolerance; LN/GELU/softmax stay f32.
    np.testing.assert_allclose(np.asarray(out), np.asarray(ref),
                               rtol=3e-2, atol=3e-2)
    print("KERNEL_OK")
</pallas_src>

<mosaic_0001>
module attributes {stable_mosaic.version = 11 : i64} {
  func.func @_attn_pool_kernel(%arg0: i32, %arg1: memref<8x8x32xf32, #tpu.memory_space<vmem>>, %arg2: memref<8x8xi32, #tpu.memory_space<vmem>>, %arg3: memref<32x32xbf16, #tpu.memory_space<vmem>>, %arg4: memref<1x32xf32, #tpu.memory_space<vmem>>, %arg5: memref<1x32xf32, #tpu.memory_space<vmem>>, %arg6: memref<1x32xf32, #tpu.memory_space<vmem>>, %arg7: memref<1x32xf32, #tpu.memory_space<vmem>>, %arg8: memref<1xf32, #tpu.memory_space<smem>>, %arg9: memref<8x32xf32, #tpu.memory_space<vmem>>) attributes {dimension_semantics = [#tpu.dimension_semantics<parallel>], iteration_bounds = array<i64: 1>, scalar_prefetch = 0 : i64, scratch_operands = 0 : i64, tpu.core_type = #tpu.core_type<tc>, window_params = [{transform_indices = @transform_0, window_bounds = array<i64: 8, 8, 32>}, {transform_indices = @transform_1, window_bounds = array<i64: 8, 8>}, {pipeline_mode = #tpu.pipeline_mode<synchronous>, transform_indices = @transform_2, window_bounds = array<i64: 32, 32>}, {pipeline_mode = #tpu.pipeline_mode<synchronous>, transform_indices = @transform_3, window_bounds = array<i64: 1, 32>}, {pipeline_mode = #tpu.pipeline_mode<synchronous>, transform_indices = @transform_4, window_bounds = array<i64: 1, 32>}, {pipeline_mode = #tpu.pipeline_mode<synchronous>, transform_indices = @transform_5, window_bounds = array<i64: 1, 32>}, {pipeline_mode = #tpu.pipeline_mode<synchronous>, transform_indices = @transform_6, window_bounds = array<i64: 1, 32>}, {transform_indices = @transform_7, window_bounds = array<i64: 1>}, {transform_indices = @transform_8, window_bounds = array<i64: 8, 32>}]} {
    %c0 = arith.constant 0 : index
    %c0_0 = arith.constant 0 : index
    %0 = vector.load %arg3[%c0, %c0_0] : memref<32x32xbf16, #tpu.memory_space<vmem>>, vector<32x32xbf16>
    %c0_1 = arith.constant 0 : index
    %c0_2 = arith.constant 0 : index
    %1 = vector.load %arg4[%c0_1, %c0_2] : memref<1x32xf32, #tpu.memory_space<vmem>>, vector<1x32xf32>
    %c0_3 = arith.constant 0 : index
    %c0_4 = arith.constant 0 : index
    %2 = vector.load %arg5[%c0_3, %c0_4] : memref<1x32xf32, #tpu.memory_space<vmem>>, vector<1x32xf32>
    %c0_5 = arith.constant 0 : index
    %c0_6 = arith.constant 0 : index
    %3 = vector.load %arg6[%c0_5, %c0_6] : memref<1x32xf32, #tpu.memory_space<vmem>>, vector<1x32xf32>
    %c0_7 = arith.constant 0 : index
    %c0_8 = arith.constant 0 : index
    %4 = vector.load %arg7[%c0_7, %c0_8] : memref<1x32xf32, #tpu.memory_space<vmem>>, vector<1x32xf32>
    %c0_9 = arith.constant 0 : index
    %5 = memref.load %arg8[%c0_9] : memref<1xf32, #tpu.memory_space<smem>>
    %c0_10 = arith.constant 0 : index
    %c0_11 = arith.constant 0 : index
    %c0_12 = arith.constant 0 : index
    %6 = vector.load %arg1[%c0_10, %c0_11, %c0_12] : memref<8x8x32xf32, #tpu.memory_space<vmem>>, vector<8x8x32xf32>
    %7 = arith.truncf %6 : vector<8x8x32xf32> to vector<8x8x32xbf16>
    %8 = vector.shape_cast %7 : vector<8x8x32xbf16> to vector<64x32xbf16>
    %cst = arith.constant dense<0.000000e+00> : vector<64x32xf32>
    %9 = tpu.matmul %8, %0, %cst {dimension_numbers = #tpu.dot_dimension_numbers<[1], [0], [0], [1], [0, 0, 1, 1], [], []>} : vector<64x32xbf16>, vector<32x32xbf16>, vector<64x32xf32> -> vector<64x32xf32>
    %10 = vector.broadcast %1 : vector<1x32xf32> to vector<64x32xf32>
    %11 = arith.addf %9, %10 : vector<64x32xf32>
    %cst_13 = arith.constant dense<0.000000e+00> : vector<64xf32>
    %12 = vector.multi_reduction <add>, %11, %cst_13 [1] : vector<64x32xf32> to vector<64xf32>
    %13 = vector.shape_cast %12 : vector<64xf32> to vector<64x1xf32>
    %cst_14 = arith.constant 3.200000e+01 : f32
    %14 = vector.broadcast %cst_14 : f32 to vector<64x1xf32>
    %15 = arith.divf %13, %14 : vector<64x1xf32>
    %16 = vector.broadcast %15 : vector<64x1xf32> to vector<64x32xf32>
    %17 = arith.subf %11, %16 : vector<64x32xf32>
    %18 = arith.mulf %17, %17 : vector<64x32xf32>
    %cst_15 = arith.constant dense<0.000000e+00> : vector<64xf32>
    %19 = vector.multi_reduction <add>, %18, %cst_15 [1] : vector<64x32xf32> to vector<64xf32>
    %20 = vector.shape_cast %19 : vector<64xf32> to vector<64x1xf32>
    %cst_16 = arith.constant 3.200000e+01 : f32
    %21 = vector.broadcast %cst_16 : f32 to vector<64x1xf32>
    %22 = arith.divf %20, %21 : vector<64x1xf32>
    %23 = vector.broadcast %15 : vector<64x1xf32> to vector<64x32xf32>
    %24 = arith.subf %11, %23 : vector<64x32xf32>
    %cst_17 = arith.constant 9.99999974E-6 : f32
    %25 = vector.broadcast %cst_17 : f32 to vector<64x1xf32>
    %26 = arith.addf %22, %25 : vector<64x1xf32>
    %27 = math.rsqrt %26 : vector<64x1xf32>
    %28 = vector.broadcast %27 : vector<64x1xf32> to vector<64x32xf32>
    %29 = arith.mulf %24, %28 : vector<64x32xf32>
    %30 = vector.broadcast %2 : vector<1x32xf32> to vector<64x32xf32>
    %31 = arith.mulf %29, %30 : vector<64x32xf32>
    %32 = vector.broadcast %3 : vector<1x32xf32> to vector<64x32xf32>
    %33 = arith.addf %31, %32 : vector<64x32xf32>
    %cst_18 = arith.constant 5.000000e-01 : f32
    %34 = vector.broadcast %cst_18 : f32 to vector<64x32xf32>
    %35 = arith.mulf %34, %33 : vector<64x32xf32>
    %cst_19 = arith.constant 0.707106769 : f32
    %36 = vector.broadcast %cst_19 : f32 to vector<64x32xf32>
    %37 = arith.mulf %33, %36 : vector<64x32xf32>
    %38 = math.erf %37 : vector<64x32xf32>
    %cst_20 = arith.constant 1.000000e+00 : f32
    %39 = vector.broadcast %cst_20 : f32 to vector<64x32xf32>
    %40 = arith.addf %39, %38 : vector<64x32xf32>
    %41 = arith.mulf %35, %40 : vector<64x32xf32>
    %42 = vector.shape_cast %41 : vector<64x32xf32> to vector<8x8x32xf32>
    %43 = vector.shape_cast %4 : vector<1x32xf32> to vector<1x1x32xf32>
    %44 = vector.broadcast %43 : vector<1x1x32xf32> to vector<8x1x32xf32>
    "tpu.trace_start"() <{level = 10 : i32, message = "bqd,bkd->bqk"}> : () -> ()
    %cst_21 = arith.constant dense<0.000000e+00> : vector<8x1x8xf32>
    %45 = tpu.matmul %44, %42, %cst_21 {dimension_numbers = #tpu.dot_dimension_numbers<[2], [2], [1], [1], [0, 0, 0, 1, 1, 1], [0], [0]>} : vector<8x1x32xf32>, vector<8x8x32xf32>, vector<8x1x8xf32> -> vector<8x1x8xf32>
    "tpu.trace_stop"() : () -> ()
    %46 = vector.broadcast %5 : f32 to vector<8x1x8xf32>
    %47 = arith.addf %45, %46 : vector<8x1x8xf32>
    %c0_22 = arith.constant 0 : index
    %c0_23 = arith.constant 0 : index
    %48 = vector.load %arg2[%c0_22, %c0_23] : memref<8x8xi32, #tpu.memory_space<vmem>>, vector<8x8xi32>
    %49 = vector.shape_cast %48 : vector<8x8xi32> to vector<8x1x8xi32>
    %c0_i32 = arith.constant 0 : i32
    %50 = vector.broadcast %c0_i32 : i32 to vector<8x1x8xi32>
    %51 = arith.cmpi eq, %49, %50 : vector<8x1x8xi32>
    %cst_24 = arith.constant 0xFF800000 : f32
    %52 = vector.broadcast %cst_24 : f32 to vector<8x1x8xf32>
    %53 = arith.select %51, %52, %47 : vector<8x1x8xi1>, vector<8x1x8xf32>
    %cst_25 = arith.constant dense<0xFF800000> : vector<8x1xf32>
    %54 = vector.multi_reduction <maximumf>, %53, %cst_25 [2] : vector<8x1x8xf32> to vector<8x1xf32>
    %55 = vector.shape_cast %54 : vector<8x1xf32> to vector<8x1x1xf32>
    %56 = vector.broadcast %55 : vector<8x1x1xf32> to vector<8x1x8xf32>
    %57 = arith.subf %53, %56 : vector<8x1x8xf32>
    %58 = math.exp %57 : vector<8x1x8xf32>
    %cst_26 = arith.constant dense<0.000000e+00> : vector<8x1xf32>
    %59 = vector.multi_reduction <add>, %58, %cst_26 [2] : vector<8x1x8xf32> to vector<8x1xf32>
    %60 = vector.shape_cast %59 : vector<8x1xf32> to vector<8x1x1xf32>
    %61 = vector.broadcast %60 : vector<8x1x1xf32> to vector<8x1x8xf32>
    %62 = arith.divf %58, %61 : vector<8x1x8xf32>
    %c0_27 = arith.constant 0 : index
    %c0_28 = arith.constant 0 : index
    %c0_29 = arith.constant 0 : index
    %63 = vector.load %arg1[%c0_27, %c0_28, %c0_29] : memref<8x8x32xf32, #tpu.memory_space<vmem>>, vector<8x8x32xf32>
    "tpu.trace_start"() <{level = 10 : i32, message = "bqs,bsd->bqd"}> : () -> ()
    %cst_30 = arith.constant dense<0.000000e+00> : vector<8x1x32xf32>
    %64 = tpu.matmul %62, %63, %cst_30 {dimension_numbers = #tpu.dot_dimension_numbers<[2], [1], [1], [2], [0, 0, 0, 1, 1, 2], [0], [0]>} : vector<8x1x8xf32>, vector<8x8x32xf32>, vector<8x1x32xf32> -> vector<8x1x32xf32>
    "tpu.trace_stop"() : () -> ()
    %65 = vector.shape_cast %64 : vector<8x1x32xf32> to vector<8x32xf32>
    %c0_31 = arith.constant 0 : index
    %c0_32 = arith.constant 0 : index
    %66 = vector.load %arg9[%c0_31, %c0_32] : memref<8x32xf32, #tpu.memory_space<vmem>>, vector<8x32xf32>
    tpu.vector_store %arg9[%c0_31, %c0_32], %65 {strides = array<i32>} : memref<8x32xf32, #tpu.memory_space<vmem>>, vector<8x32xf32>,
    return
  }
  func.func @transform_0(%arg0: i32) -> (i32, i32, i32) {
    %c0_i32 = arith.constant 0 : i32
    %c0_i32_0 = arith.constant 0 : i32
    %c0_i32_1 = arith.constant 0 : i32
    return %arg0, %c0_i32, %c0_i32_0 : i32, i32, i32
  }
  func.func @transform_1(%arg0: i32) -> (i32, i32) {
    %c0_i32 = arith.constant 0 : i32
    %c0_i32_0 = arith.constant 0 : i32
    return %arg0, %c0_i32 : i32, i32
  }
  func.func @transform_2(%arg0: i32) -> (i32, i32) {
    %c0_i32 = arith.constant 0 : i32
    %c0_i32_0 = arith.constant 0 : i32
    %c0_i32_1 = arith.constant 0 : i32
    return %c0_i32, %c0_i32_0 : i32, i32
  }
  func.func @transform_3(%arg0: i32) -> (i32, i32) {
    %c0_i32 = arith.constant 0 : i32
    %c0_i32_0 = arith.constant 0 : i32
    %c0_i32_1 = arith.constant 0 : i32
    return %c0_i32, %c0_i32_0 : i32, i32
  }
  func.func @transform_4(%arg0: i32) -> (i32, i32) {
    %c0_i32 = arith.constant 0 : i32
    %c0_i32_0 = arith.constant 0 : i32
    %c0_i32_1 = arith.constant 0 : i32
    return %c0_i32, %c0_i32_0 : i32, i32
  }
  func.func @transform_5(%arg0: i32) -> (i32, i32) {
    %c0_i32 = arith.constant 0 : i32
    %c0_i32_0 = arith.constant 0 : i32
    %c0_i32_1 = arith.constant 0 : i32
    return %c0_i32, %c0_i32_0 : i32, i32
  }
  func.func @transform_6(%arg0: i32) -> (i32, i32) {
    %c0_i32 = arith.constant 0 : i32
    %c0_i32_0 = arith.constant 0 : i32
    %c0_i32_1 = arith.constant 0 : i32
    return %c0_i32, %c0_i32_0 : i32, i32
  }
  func.func @transform_7(%arg0: i32) -> i32 {
    %c0_i32 = arith.constant 0 : i32
    %c0_i32_0 = arith.constant 0 : i32
    return %c0_i32 : i32
  }
  func.func @transform_8(%arg0: i32) -> (i32, i32) {
    %c0_i32 = arith.constant 0 : i32
    %c0_i32_0 = arith.constant 0 : i32
    return %arg0, %c0_i32 : i32, i32
  }
}

</mosaic_0001>

<bundles_post_ra>
// kernel: tpu_custom_call.1
= control target key start
LH: loop header
LB: loop body
LE: loop exit
PB: predicated region body
PF: predicated region fallthrough
CT: control target
= control target key end

     0   :  { %14 = vsyncpa [#allocation4], 0  ;;  %s2418_s0 = inlined_call_operand.hbm [shape: f32[8,8,32], index: 0, kind: input, shape index: {}]   ;;  %s2419_s1 = inlined_call_operand.hbm [shape: s32[8,8], index: 1, kind: input, shape index: {}]   ;;  %s2420_s2 = inlined_call_operand.hbm [shape: bf16[32,32], index: 2, kind: input, shape index: {}]   ;;  %s2421_s3 = inlined_call_operand.vmem [shape: f32[1,32], index: 3, kind: input, shape index: {}]   ;;  %s2422_s4 = inlined_call_operand.vmem [shape: f32[1,32], index: 4, kind: input, shape index: {}]   ;;  %s2423_s5 = inlined_call_operand.vmem [shape: f32[1,32], index: 5, kind: input, shape index: {}]   ;;  %s2424_s6 = inlined_call_operand.vmem [shape: f32[1,32], index: 6, kind: input, shape index: {}]   ;;  %s2425_s7 = inlined_call_operand.<no memory space> [shape: f32[1], index: 7, kind: input, shape index: {}]   ;;  %s2426_s8 = inlined_call_operand.hbm [shape: f32[8,32], index: 8, kind: output, shape index: {}]  }
   0x1   :  { %15 = vsyncpa [#allocation7], 0 }
   0x2   :  { %16 = vsyncpa [#allocation5], 0  ;;  %s2111_s27 = smov [#allocation6]   ;;  %s2112_s29 = smov [#allocation3]  }
   0x3   :  { %s35_s28 = sshll.u32 %s2111_s27, 4  ;;  %s22_s30 = sshll.u32 %s2112_s29, 4  ;;  %s36_s28 = int_to_ptr.vmem [resolvable:$true] %s35_s28  ;;  %s2167_s30 = int_to_ptr.vmem [resolvable:$true] %s22_s30 }
   0x4   :  { %s2017_s11 = scalar_lea.hbm %s2419_s1, 128 }
   0x5   :  { %p2018_p0 = scmp.ne.s32.totalorder %s2419_s1, %s2017_s11  ;;  %p2021_p1 = scmp.lt.u32.totalorder %s2017_s11, %s2419_s1 }
   0x7   :  { %p2023_p2 = pnand %p2021_p1, %p2018_p0 }
   0x9   :  { %2026 = shalt.err (!%p2023_p2)
}
   0xa   :  { %s2027_s16 = scalar_lea.vmem %s36_s28, 128  ;;  %p2032_p4 = scmp.lt.s32.totalorder %s36_s28, %s36_s28 }
   0xb   :  { %p2028_p3 = scmp.ne.s32.totalorder %s36_s28, %s2027_s16  ;;  %p2033_p5 = scmp.lt.s32.totalorder %s2027_s16, %s2027_s16 }
   0xd   :  { %p2034_p6 = por %p2033_p5, %p2032_p4 }
   0xf   :  { %p2035_p7 = pnand %p2034_p6, %p2028_p3 }
  0x11   :  { %2038 = shalt.err (!%p2035_p7)
}
  0x12   :  { %38 = dma.hbm_to_vmem [thread:$0]  %s2419_s1, 128, %s36_s28, [#allocation7]  }
  0x13   :  { %s2039_s21 = scalar_lea.hbm %s2418_s0, 1024 }
  0x14   :  { %p2040_p8 = scmp.ne.s32.totalorder %s2418_s0, %s2039_s21  ;;  %p2043_p9 = scmp.lt.u32.totalorder %s2039_s21, %s2418_s0 }
  0x16   :  { %p2045_p10 = pnand %p2043_p9, %p2040_p8 }
  0x18   :  { %2048 = shalt.err (!%p2045_p10)
}
  0x19   :  { %s2049_s26 = scalar_lea.vmem %s2167_s30, 1024  ;;  %p2054_p12 = scmp.lt.s32.totalorder %s2167_s30, %s2167_s30 }
  0x1a   :  { %p2050_p11 = scmp.ne.s32.totalorder %s2167_s30, %s2049_s26  ;;  %p2055_p13 = scmp.lt.s32.totalorder %s2049_s26, %s2049_s26 }
  0x1c   :  { %p2056_p0 = por %p2055_p13, %p2054_p12 }
  0x1e   :  { %p2057_p1 = pnand %p2056_p0, %p2050_p11 }
  0x20   :  { %2060 = shalt.err (!%p2057_p1)
}
  0x21   :  { %s2113_s1 = smov 128   ;;  %s2114_s27 = smov 8  }
  0x22   :  { %28 = dma.hbm_to_vmem [thread:$0]  %s2418_s0, 1024, %s2167_s30, [#allocation4], %s2113_s1, %s2113_s1, %s2114_s27  }
  0x23   :  { %s2115_s9 = smov [#allocation8]   ;;  %s2061_s13 = scalar_lea.hbm %s2420_s2, 256 }
  0x24   :  { %s44_s10 = sshll.u32 %s2115_s9, 4  ;;  %p2062_p2 = scmp.ne.s32.totalorder %s2420_s2, %s2061_s13  ;;  %s45_s10 = int_to_ptr.vmem [resolvable:$true] %s44_s10 }
  0x25   :  { %p2065_p3 = scmp.lt.u32.totalorder %s2061_s13, %s2420_s2 }
  0x27   :  { %p2067_p4 = pnand %p2065_p3, %p2062_p2 }
  0x29   :  { %2070 = shalt.err (!%p2067_p4)
}
  0x2a   :  { %s2071_s18 = scalar_lea.vmem %s45_s10, 256  ;;  %p2076_p6 = scmp.lt.s32.totalorder %s45_s10, %s45_s10 }
  0x2b   :  { %p2072_p5 = scmp.ne.s32.totalorder %s45_s10, %s2071_s18  ;;  %p2077_p7 = scmp.lt.s32.totalorder %s2071_s18, %s2071_s18 }
  0x2d   :  { %p2078_p8 = por %p2077_p7, %p2076_p6 }
  0x2f   :  { %p2079_p9 = pnand %p2078_p8, %p2072_p5 }
  0x31   :  { %2082 = shalt.err (!%p2079_p9)
}
  0x32   :  { %s2116_s0 = smov 64   ;;  %s2117_s30 = smov 4  }
  0x33   :  { %50 = dma.hbm_to_vmem [thread:$0]  %s2420_s2, 256, %s45_s10, [#allocation7], %s2116_s0, %s2116_s0, %s2117_s30  }
  0x34   :  { %2105 = dma.done.wait [#allocation4], 1024  }
  0x35   :  { %2106 = vsyncadd [#allocation4], 4294966272 }
  0x36   :  { %2107 = dma.done.wait [#allocation7], 384  }
  0x37   :  { %2108 = vsyncadd [#allocation7], 4294966912  ;;  %v1950_v0 = vld [vmem:[#allocation8] sm:$0xff]   ;;  %v1951_v1 = vld [vmem:[#allocation8 + $0x8] sm:$0xff]   ;;  %vm134_vm0 = vcmask 261120   ;;  %vm2119_vm1 = vmmov 0  }
  0x38   :  { %1847 = vmatprep.subr.bf16.mxu0 %v1950_v0  ;;  %v2210_v2 = vld [vmem:[#allocation3] sm:$0xff]  ;;  %v2212_v3 = vld [vmem:[#allocation3 + $0x8] sm:$0xff]  ;;  %v2216_v5 = vld [vmem:[#allocation3 + $0x10] sm:$0xff]  ;;  %vm1039_vm3 = vcmask 57344   ;;  %vm1136_vm11 = vcmask 64512   ;;  %vm1730_vm12 = vcmask 1041409  }
  0x39   :  { %1848 = vmatpush3.bf16.msra.mxu0 %v1950_v0  ;;  %v1805_v4 = vpack.c.bf16 %v2212_v3, %v2210_v2  ;;  %v2218_v6 = vld [vmem:[#allocation3 + $0x18] sm:$0xff]  ;;  %v2220_v7 = vld [vmem:[#allocation3 + $0x20] sm:$0xff]  ;;  %v2222_v8 = vld [vmem:[#allocation3 + $0x28] sm:$0xff]  ;;  %vm1733_vm13 = vcmask 1042434   ;;  %vm1736_vm14 = vcmask 1043459   ;;  %vm1739_vm15 = vcmask 1044484  }
  0x3a   :  { %1849 = vmatprep.subr.bf16.mxu0 %v1951_v1  ;;  %v1806_v9 = vpack.c.bf16 %v2218_v6, %v2216_v5  ;;  %v1807_v10 = vpack.c.bf16 %v2222_v8, %v2220_v7  ;;  %v2231_v11 = vld [vmem:[#allocation3 + $0x30] sm:$0xff]  ;;  %v2233_v12 = vld [vmem:[#allocation3 + $0x38] sm:$0xff]  ;;  %v1768_v14 = vld [vmem:[%s2421_s3] ss:$0 sm:$0xff] }
  0x3b   :  { %1851 = vmatprep.mubr.msk.bf16.mxu0 %vm134_vm0, %v1805_v4  ;;  %v1808_v13 = vpack.c.bf16 %v2233_v12, %v2231_v11 }
  0x3d   :  { %1850 = vmatpush3.bf16.msra.mxu0 %v1951_v1 }
  0x40   :  { %1852 = vmatmul.mubr.msk.bf16.vlgmr.msra.gmra.mrb[0].mxu0 %vm134_vm0, %v1806_v9 }
  0x41   :  { %1855 = vmatprep.mubr.msk.bf16.mxu0 %vm134_vm0, %v1807_v10 }
  0x48   :  { %1856 = vmatmul.mubr.msk.bf16.gmra.mrb[4].mxu0 %vm134_vm0, %v1808_v13 }
 0x113   :  { %v1853_v15 = vpop.f32.mrb[0].mxu0 }
 0x114   :  { %v190_v16 = vadd.f32 %v1853_v15, %v1768_v14  ;;  %v181_v17 = vpop.f32.mrb[1].mxu0 }
 0x115   :  { %v182_v18 = vadd.f32 %v1768_v14, %v181_v17  ;;  %v1854_v19 = vpop.f32.mrb[2].mxu0 }
 0x116   :  { %v193_v20 = vadd.f32 %v1854_v19, %v1768_v14  ;;  %v184_v21 = vpop.f32.mrb[3].mxu0  ;;  %v218_v22 = vsel %vm134_vm0, %v190_v16, 0.0 }
 0x117   :  { %v185_v23 = vadd.f32 %v1768_v14, %v184_v21  ;;  %219 = vadd.xlane.f32.xlu1 %v218_v22  ;;  %v212_v24 = vsel %vm134_vm0, %v182_v18, 0.0 }
 0x118   :  { %213 = vadd.xlane.f32.xlu0 %v212_v24  ;;  %v221_v25 = vsel %vm134_vm0, %v193_v20, 0.0 }
 0x119   :  { %v215_v27 = vsel %vm134_vm0, %v185_v23, 0.0 }
 0x11b   :  { %222 = vadd.xlane.f32.xlu1 %v221_v25  ;;  %v1857_v26 = vpop.f32.mrb[4].mxu0 }
 0x11c   :  { %v197_v28 = vpop.f32.mrb[5].mxu0  ;;  %216 = vadd.xlane.f32.xlu0 %v215_v27  ;;  %v206_v29 = vadd.f32 %v1857_v26, %v1768_v14 }
 0x11d   :  { %v198_v30 = vadd.f32 %v1768_v14, %v197_v28  ;;  %v1858_v31 = vpop.f32.mrb[6].mxu0 }
 0x11e   :  { %v200_v32 = vpop.f32.mrb[7].mxu0  ;;  %v209_v33 = vadd.f32 %v1858_v31, %v1768_v14  ;;  %v230_v37 = vsel %vm134_vm0, %v206_v29, 0.0 }
 0x11f   :  { %v201_v34 = vadd.f32 %v1768_v14, %v200_v32  ;;  %v224_v35 = vsel %vm134_vm0, %v198_v30, 0.0 }
 0x120   :  { %225 = vadd.xlane.f32.xlu0 %v224_v35  ;;  %v233_v38 = vsel %vm134_vm0, %v209_v33, 0.0 }
 0x121   :  { %v227_v36 = vsel %vm134_vm0, %v201_v34, 0.0 }
 0x122   :  { %228 = vadd.xlane.f32.xlu1 %v227_v36 }
 0x124   :  { %231 = vadd.xlane.f32.xlu0 %v230_v37 }
 0x126   :  { %234 = vadd.xlane.f32.xlu1 %v233_v38 }
 0x1a4   :  { %v220_v39 = vpop.xlane.xlu1 %219 }
 0x1a5   :  { %v239_v40 = vmul.f32 0.03125, %v220_v39  ;;  %v214_v41 = vpop.xlane.xlu0 %213 }
 0x1a6   :  { %v237_v42 = vmul.f32 0.03125, %v214_v41 }
 0x1a7   :  { %v2249_v43 = vsub.f32 %v190_v16, %v239_v40 }
 0x1a8   :  { %v2251_v44 = vsub.f32 %v182_v18, %v237_v42  ;;  %v223_v45 = vpop.xlane.xlu1 %222 }
 0x1a9   :  { %v240_v46 = vmul.f32 0.03125, %v223_v45  ;;  %v217_v47 = vpop.xlane.xlu0 %216  ;;  %v255_v53 = vmul.f32 %v2249_v43, %v2249_v43 }
 0x1aa   :  { %v238_v48 = vmul.f32 0.03125, %v217_v47  ;;  %v253_v49 = vmul.f32 %v2251_v44, %v2251_v44 }
 0x1ab   :  { %v2255_v50 = vsub.f32 %v193_v20, %v240_v46  ;;  %v267_v61 = vsel %vm134_vm0, %v255_v53, 0.0  ;;  %v1779_v46 = vld [vmem:[%s2422_s4] ss:$0 sm:$0xff] }
 0x1ac   :  { %v2257_v51 = vsub.f32 %v185_v23, %v238_v48  ;;  %v261_v52 = vsel %vm134_vm0, %v253_v49, 0.0  ;;  %v2118_v23 = vmov 0.0  }
 0x1ad   :  { %262 = vadd.xlane.f32.xlu0 %v261_v52  ;;  %v226_v54 = vpop.xlane.xlu0 %225  ;;  %v256_v58 = vmul.f32 %v2255_v50, %v2255_v50  ;;  %1859 = vmatprep.subr.mxu1 %v2118_v23 }
 0x1ae   :  { %v241_v55 = vmul.f32 0.03125, %v226_v54  ;;  %v254_v56 = vmul.f32 %v2257_v51, %v2257_v51  ;;  %1884 = vmatprep.subr.mxu0 %v2118_v23  ;;  %1861 = vmatprep.mubr.msk.f32.mxu1 %vm2119_vm1, %v2118_v23  ;;  %v1780_v54 = vld [vmem:[%s2423_s5] ss:$0 sm:$0xff] }
 0x1af   :  { %v229_v57 = vpop.xlane.xlu1 %228  ;;  %v270_v10 = vsel %vm134_vm0, %v256_v58, 0.0  ;;  %1886 = vmatprep.mubr.msk.f32.mxu0 %vm2119_vm1, %v2118_v23 }
 0x1b0   :  { %v2266_v59 = vsub.f32 %v198_v30, %v241_v55  ;;  %v242_v60 = vmul.f32 0.03125, %v229_v57  ;;  %v264_v62 = vsel %vm134_vm0, %v254_v56, 0.0 }
 0x1b1   :  { %268 = vadd.xlane.f32.xlu0 %v267_v61  ;;  %265 = vadd.xlane.f32.xlu1 %v264_v62  ;;  %v232_v63 = vpop.xlane.xlu0 %231 }
 0x1b2   :  { %v2270_v0 = vsub.f32 %v201_v34, %v242_v60  ;;  %v243_v1 = vmul.f32 0.03125, %v232_v63  ;;  %v257_v4 = vmul.f32 %v2266_v59, %v2266_v59 }
 0x1b3   :  { %v235_v9 = vpop.xlane.xlu1 %234 }
 0x1b4   :  { %v2275_v13 = vsub.f32 %v206_v29, %v243_v1  ;;  %v244_v14 = vmul.f32 0.03125, %v235_v9  ;;  %v273_v15 = vsel %vm134_vm0, %v257_v4, 0.0  ;;  %v258_v16 = vmul.f32 %v2270_v0, %v2270_v0 }
 0x1b5   :  { %271 = vadd.xlane.f32.xlu1 %v270_v10  ;;  %274 = vadd.xlane.f32.xlu0 %v273_v15 }
 0x1b6   :  { %v2280_v17 = vsub.f32 %v209_v33, %v244_v14  ;;  %v259_v18 = vmul.f32 %v2275_v13, %v2275_v13  ;;  %v276_v19 = vsel %vm134_vm0, %v258_v16, 0.0 }
 0x1b8   :  { %v279_v20 = vsel %vm134_vm0, %v259_v18, 0.0  ;;  %v260_v21 = vmul.f32 %v2280_v17, %v2280_v17 }
 0x1b9   :  { %277 = vadd.xlane.f32.xlu1 %v276_v19  ;;  %280 = vadd.xlane.f32.xlu0 %v279_v20 }
 0x1ba   :  { %v282_v22 = vsel %vm134_vm0, %v260_v21, 0.0 }
 0x1bd   :  { %283 = vadd.xlane.f32.xlu1 %v282_v22 }
 0x23a   :  { %v263_v24 = vpop.xlane.xlu0 %262 }
 0x23b   :  { %v285_v25 = vmul.f32 0.03125, %v263_v24 }
 0x23d   :  { %v293_v26 = vadd.f32 1e-05, %v285_v25 }
 0x23e   :  { %v266_v27 = vpop.xlane.xlu1 %265  ;;  %v269_v28 = vpop.xlane.xlu0 %268 }
 0x23f   :  { %1953 = vrsqrt.f32 %v293_v26  ;;  %v286_v29 = vmul.f32 0.03125, %v266_v27  ;;  %v287_v30 = vmul.f32 0.03125, %v269_v28 }
 0x241   :  { %v294_v31 = vadd.f32 1e-05, %v286_v29  ;;  %v295_v32 = vadd.f32 1e-05, %v287_v30 }
 0x242   :  { %v272_v33 = vpop.xlane.xlu1 %271  ;;  %v275_v34 = vpop.xlane.xlu0 %274 }
 0x243   :  { %1955 = vrsqrt.f32 %v294_v31  ;;  %v288_v35 = vmul.f32 0.03125, %v272_v33  ;;  %v289_v36 = vmul.f32 0.03125, %v275_v34 }
 0x244   :  { %1957 = vrsqrt.f32 %v295_v32 }
 0x245   :  { %v296_v37 = vadd.f32 1e-05, %v288_v35  ;;  %v297_v38 = vadd.f32 1e-05, %v289_v36 }
 0x246   :  { %v278_v39 = vpop.xlane.xlu1 %277  ;;  %v281_v40 = vpop.xlane.xlu0 %280 }
 0x247   :  { %1959 = vrsqrt.f32 %v296_v37  ;;  %v290_v41 = vmul.f32 0.03125, %v278_v39  ;;  %v291_v42 = vmul.f32 0.03125, %v281_v40 }
 0x248   :  { %1961 = vrsqrt.f32 %v297_v38 }
 0x249   :  { %v1954_v45 = vpop.eup %1953  ;;  %v298_v47 = vadd.f32 1e-05, %v290_v41  ;;  %v299_v48 = vadd.f32 1e-05, %v291_v42 }
 0x24a   :  { %v284_v49 = vpop.xlane.xlu1 %283  ;;  %v309_v52 = vmul.f32 %v1954_v45, %v2251_v44 }
 0x24b   :  { %1963 = vrsqrt.f32 %v298_v47  ;;  %v292_v53 = vmul.f32 0.03125, %v284_v49 }
 0x24c   :  { %1965 = vrsqrt.f32 %v299_v48  ;;  %v323_v55 = vmul.f32 %v1779_v46, %v309_v52 }
 0x24d   :  { %v1956_v56 = vpop.eup %1955  ;;  %v300_v57 = vadd.f32 1e-05, %v292_v53 }
 0x24e   :  { %v1958_v58 = vpop.eup %1957  ;;  %v310_v60 = vmul.f32 %v1956_v56, %v2257_v51  ;;  %v337_v61 = vadd.f32 %v1780_v54, %v323_v55 }
 0x24f   :  { %v311_v62 = vmul.f32 %v1958_v58, %v2249_v43  ;;  %1967 = vrsqrt.f32 %v300_v57 }
 0x250   :  { %v324_v63 = vmul.f32 %v1779_v46, %v310_v60  ;;  %v353_v1 = vmul.f32 0.70710677, %v337_v61 }
 0x251   :  { %v1960_v44 = vpop.eup %1959  ;;  %v325_v4 = vmul.f32 %v1779_v46, %v311_v62 }
 0x252   :  { %v1962_v9 = vpop.eup %1961  ;;  %v312_v10 = vmul.f32 %v1960_v44, %v2255_v50  ;;  %1969 = verf.f32 %v353_v1  ;;  %v338_v14 = vadd.f32 %v1780_v54, %v324_v63 }
 0x253   :  { %v313_v15 = vmul.f32 %v1962_v9, %v2266_v59  ;;  %v339_v16 = vadd.f32 %v1780_v54, %v325_v4 }
 0x254   :  { %v326_v18 = vmul.f32 %v1779_v46, %v312_v10  ;;  %v354_v19 = vmul.f32 0.70710677, %v338_v14  ;;  %v346_v42 = vmul.f32 0.5, %v338_v14 }
 0x255   :  { %v1964_v20 = vpop.eup %1963  ;;  %v327_v51 = vmul.f32 %v1779_v46, %v313_v15  ;;  %v355_v21 = vmul.f32 0.70710677, %v339_v16  ;;  %v347_v49 = vmul.f32 0.5, %v339_v16 }
 0x256   :  { %v1966_v22 = vpop.eup %1965  ;;  %v314_v43 = vmul.f32 %v1964_v20, %v2270_v0  ;;  %1971 = verf.f32 %v354_v19  ;;  %v340_v24 = vadd.f32 %v1780_v54, %v326_v18  ;;  %v345_v0 = vmul.f32 0.5, %v337_v61 }
 0x257   :  { %v315_v25 = vmul.f32 %v1966_v22, %v2275_v13  ;;  %1973 = verf.f32 %v355_v21  ;;  %v341_v26 = vadd.f32 %v1780_v54, %v327_v51  ;;  %v2120_v19 = vmov 1966171168  }
 0x258   :  { %v328_v50 = vmul.f32 %v1779_v46, %v314_v43  ;;  %v356_v27 = vmul.f32 0.70710677, %v340_v24  ;;  %v348_v56 = vmul.f32 0.5, %v340_v24  ;;  %v976_v20 = vunpack.c.l.s4 %v2120_v19  ;;  %v973_v43 = vld [vmem:[#allocation6] sm:$0xff] }
 0x259   :  { %v1968_v28 = vpop.eup %1967  ;;  %v329_v29 = vmul.f32 %v1779_v46, %v315_v25  ;;  %v357_v59 = vmul.f32 0.70710677, %v341_v26  ;;  %v349_v44 = vmul.f32 0.5, %v341_v26  ;;  %v978_v51 = vlaneseq }
 0x25a   :  { %v316_v30 = vmul.f32 %v1968_v28, %v2280_v17  ;;  %1975 = verf.f32 %v356_v27  ;;  %v342_v31 = vadd.f32 %v1780_v54, %v328_v50  ;;  %v78_v17 = vld [vmem:[%s2424_s6] sm:$0x1]  ;;  %v977_v21 = vunpack.c.0.s8 %v976_v20 }
 0x25b   :  { %v343_v32 = vadd.f32 %v1780_v54, %v329_v29  ;;  %1977 = verf.f32 %v357_v59  ;;  %v979_v22 = vshrl.u32 %v978_v51, 7  ;;  %v974_v25 = vcombine.high %v973_v43, %v973_v43 }
 0x25c   :  { %v1970_v33 = vpop.eup %1969  ;;  %v330_v34 = vmul.f32 %v1779_v46, %v316_v30  ;;  %v358_v35 = vmul.f32 0.70710677, %v342_v31  ;;  %v350_v57 = vmul.f32 0.5, %v342_v31 }
 0x25d   :  { %v369_v36 = vadd.f32 1.0, %v1970_v33  ;;  %v359_v37 = vmul.f32 0.70710677, %v343_v32  ;;  %v351_v16 = vmul.f32 0.5, %v343_v32 }
 0x25e   :  { %1979 = verf.f32 %v358_v35  ;;  %v344_v13 = vadd.f32 %v1780_v54, %v330_v34 }
 0x25f   :  { %v377_v38 = vmul.f32 %v369_v36, %v345_v0  ;;  %1981 = verf.f32 %v359_v37 }
 0x260   :  { %v1972_v39 = vpop.eup %1971  ;;  %v360_v40 = vmul.f32 0.70710677, %v344_v13  ;;  %v352_v4 = vmul.f32 0.5, %v344_v13 }
 0x261   :  { %v1974_v41 = vpop.eup %1973  ;;  %1860 = vmatpush3.xpose.msk.msra.mxu1 %vm134_vm0, %v377_v38  ;;  %v370_v45 = vadd.f32 1.0, %v1972_v39 }
 0x262   :  { %1864 = vmatprep.subr.mxu1 %v2118_v23  ;;  %1983 = verf.f32 %v360_v40  ;;  %v371_v47 = vadd.f32 1.0, %v1974_v41 }
 0x263   :  { %v378_v46 = vmul.f32 %v370_v45, %v346_v42 }
 0x264   :  { %v1976_v48 = vpop.eup %1975  ;;  %1862 = vmatmul.mubr.msk.f32.vlgmr.msra.gmra.mrb[0].mxu1 %vm134_vm0, %v78_v17  ;;  %v379_v53 = vmul.f32 %v371_v47, %v347_v49 }
 0x265   :  { %1865 = vmatpush3.xpose.msk.msra.mxu1 %vm134_vm0, %v378_v46  ;;  %1866 = vmatprep.mubr.msk.f32.mxu1 %vm2119_vm1, %v2118_v23  ;;  %v1978_v52 = vpop.eup %1977  ;;  %v372_v54 = vadd.f32 1.0, %v1976_v48 }
 0x266   :  { %1869 = vmatprep.subr.mxu1 %v2118_v23  ;;  %v373_v63 = vadd.f32 1.0, %v1978_v52 }
 0x267   :  { %v380_v61 = vmul.f32 %v372_v54, %v348_v56 }
 0x268   :  { %v1980_v55 = vpop.eup %1979  ;;  %1867 = vmatmul.mubr.msk.f32.vlgmr.msra.gmra.mrb[2].mxu1 %vm134_vm0, %v78_v17  ;;  %v381_v10 = vmul.f32 %v373_v63, %v349_v44 }
 0x269   :  { %1870 = vmatpush3.xpose.msk.msra.mxu1 %vm134_vm0, %v379_v53  ;;  %1871 = vmatprep.mubr.msk.f32.mxu1 %vm2119_vm1, %v2118_v23  ;;  %v374_v58 = vadd.f32 1.0, %v1980_v55  ;;  %v1982_v60 = vpop.eup %1981 }
 0x26a   :  { %1874 = vmatprep.subr.mxu1 %v2118_v23  ;;  %v375_v15 = vadd.f32 1.0, %v1982_v60 }
 0x26b   :  { %v382_v62 = vmul.f32 %v374_v58, %v350_v57 }
 0x26c   :  { %v1984_v1 = vpop.eup %1983  ;;  %1872 = vmatmul.mubr.msk.f32.vlgmr.msra.gmra.mrb[4].mxu1 %vm134_vm0, %v78_v17  ;;  %v383_v18 = vmul.f32 %v375_v15, %v351_v16 }
 0x26d   :  { %1875 = vmatpush3.xpose.msk.msra.mxu1 %vm134_vm0, %v380_v61  ;;  %1885 = vmatpush3.xpose.msk.msra.mxu0 %vm134_vm0, %v382_v62  ;;  %v376_v9 = vadd.f32 1.0, %v1984_v1 }
 0x26e   :  { %1876 = vmatprep.mubr.msk.f32.mxu1 %vm2119_vm1, %v2118_v23  ;;  %1879 = vmatprep.subr.mxu1 %v2118_v23 }
 0x26f   :  { %1894 = vmatprep.subr.mxu0 %v2118_v23  ;;  %v384_v14 = vmul.f32 %v376_v9, %v352_v4 }
 0x270   :  { %1877 = vmatmul.mubr.msk.f32.vlgmr.msra.gmra.mrb[6].mxu1 %vm134_vm0, %v78_v17  ;;  %1887 = vmatmul.mubr.msk.f32.vlgmr.msra.gmra.mrb[8].mxu0 %vm134_vm0, %v78_v17 }
 0x271   :  { %1880 = vmatpush3.xpose.msk.msra.mxu1 %vm134_vm0, %v381_v10  ;;  %1895 = vmatpush3.xpose.msk.msra.mxu0 %vm134_vm0, %v384_v14 }
 0x272   :  { %1881 = vmatprep.mubr.msk.f32.mxu1 %vm2119_vm1, %v2118_v23  ;;  %1889 = vmatprep.subr.mxu1 %v2118_v23 }
 0x273   :  { %1896 = vmatprep.mubr.msk.f32.mxu0 %vm2119_vm1, %v2118_v23  ;;  %1904 = vmatprep.subr.mxu0 %v2118_v23 }
 0x274   :  { %1882 = vmatmul.mubr.msk.f32.vlgmr.msra.gmra.mrb[8].mxu1 %vm134_vm0, %v78_v17  ;;  %1897 = vmatmul.mubr.msk.f32.vlgmr.msra.gmra.mrb[10].mxu0 %vm134_vm0, %v78_v17 }
 0x275   :  { %1890 = vmatpush3.xpose.msk.msra.mxu1 %vm134_vm0, %v383_v18  ;;  %1891 = vmatprep.mubr.msk.f32.mxu1 %vm2119_vm1, %v2118_v23 }
 0x276   :  { %1899 = vmatprep.subr.mxu1 %v2118_v23  ;;  %1905 = vmatpush3.msra.mxu0 %v2212_v3  ;;  %v980_v3 = vsub.s32 %v977_v21, %v979_v22 }
 0x277   :  { %1906 = vmatprep.mubr.msk.f32.mxu0 %vm2119_vm1, %v2118_v23  ;;  %1914 = vmatprep.subr.mxu0 %v2118_v23 }
 0x278   :  { %1892 = vmatmul.mubr.msk.f32.vlgmr.msra.gmra.mrb[10].mxu1 %vm134_vm0, %v78_v17  ;;  %v981_v24 = vrot.slane %v973_v43, %v980_v3  ;;  %v988_v29 = vrot.slane %v974_v25, %v980_v3 }
 0x279   :  { %1900 = vmatpush3.msra.mxu1 %v2210_v2  ;;  %1901 = vmatprep.mubr.msk.f32.mxu1 %vm2119_vm1, %v2118_v23  ;;  %v385_v2 = vstv %s2425_s7  ;;  %s2121_s7 = smov [#allocation9]  }
 0x27a   :  { %1909 = vmatprep.subr.mxu1 %v2118_v23  ;;  %v997_v26 = vrot.slane %v981_v24, %v980_v3  ;;  %v989_v50 = vcombine.high %v981_v24, %v981_v24  ;;  %v990_v35 = vcombine.high %v988_v29, %v988_v29  ;;  %v1004_v48 = vrot.slane %v988_v29, %v980_v3  ;;  %s1758_s26 = sshll.u32 %s2121_s7, 4  ;;  %s1759_s26 = int_to_ptr.vmem [resolvable:$true] %s1758_s26 }
 0x27b   :  { %s2083_s1 = scalar_lea.vmem %s1759_s26, 128  ;;  %p2088_p11 = scmp.lt.s32.totalorder %s1759_s26, %s1759_s26 }
 0x27c   :  { %vm1023_vm2 = vcmp.eq.s32.totalorder %v997_v26, 0  ;;  %v1011_v28 = vrot.slane %v989_v50, %v980_v3  ;;  %v1019_v34 = vcombine.high %v997_v26, %v997_v26  ;;  %v1018_v40 = vrot.slane %v990_v35, %v980_v3  ;;  %p2084_p10 = scmp.ne.s32.totalorder %s1759_s26, %s2083_s1  ;;  %p2089_p12 = scmp.lt.s32.totalorder %s2083_s1, %s2083_s1 }
 0x27d   :  { %vm1027_vm8 = vcmp.eq.s32.totalorder %v1004_v48, 0  ;;  %v1020_v62 = vcombine.high %v1004_v48, %v1004_v48 }
 0x27e   :  { %vm1024_vm4 = vcmp.eq.s32.totalorder %v1011_v28, 0  ;;  %v1021_v13 = vcombine.high %v1011_v28, %v1011_v28  ;;  %vm1025_vm5 = vcmp.eq.s32.totalorder %v1019_v34, 0  ;;  %vm1028_vm7 = vcmp.eq.s32.totalorder %v1018_v40, 0  ;;  %p2090_p13 = por %p2089_p12, %p2088_p11 }
 0x27f   :  { %v1022_v49 = vcombine.high %v1018_v40, %v1018_v40  ;;  %vm1029_vm10 = vcmp.eq.s32.totalorder %v1020_v62, 0 }
 0x280   :  { %vm1026_vm6 = vcmp.eq.s32.totalorder %v1021_v13, 0  ;;  %p2091_p0 = pnand %p2090_p13, %p2084_p10 }
 0x281   :  { %vm1030_vm9 = vcmp.eq.s32.totalorder %v1022_v49, 0 }
 0x337   :  { %v458_v27 = vpop.f32.mrb[0].mxu1 }
 0x338   :  { %v459_v59 = vadd.f32 %v458_v27, %v385_v2  ;;  %v1863_v30 = vpop.f32.mrb[1].mxu1 }
 0x33a   :  { %v1031_v31 = vsel %vm1023_vm2, -inf, %v459_v59  ;;  %vm1745_vm2 = vcmask 1046534  }
 0x33b   :  { %v531_v32 = vpop.f32.mrb[2].mxu1  ;;  %v1040_v33 = vsel %vm1039_vm3, %v1031_v31, -inf }
 0x33c   :  { %v532_v0 = vadd.f32 %v531_v32, %v385_v2  ;;  %1041 = vmax.xlane.f32.xlu0 %v1040_v33  ;;  %v1868_v36 = vpop.f32.mrb[3].mxu1 }
 0x33e   :  { %v1032_v37 = vsel %vm1024_vm4, -inf, %v532_v0 }
 0x33f   :  { %v604_v38 = vpop.f32.mrb[4].mxu1  ;;  %v1043_v39 = vsel %vm1039_vm3, %v1032_v37, -inf }
 0x340   :  { %v605_v41 = vadd.f32 %v604_v38, %v385_v2  ;;  %1044 = vmax.xlane.f32.xlu1 %v1043_v39  ;;  %v1873_v17 = vpop.f32.mrb[5].mxu1 }
 0x342   :  { %v1033_v42 = vsel %vm1025_vm5, -inf, %v605_v41 }
 0x343   :  { %v677_v45 = vpop.f32.mrb[6].mxu1  ;;  %v1046_v46 = vsel %vm1039_vm3, %v1033_v42, -inf  ;;  %v823_v47 = vpop.f32.mrb[8].mxu0 }
 0x344   :  { %v678_v52 = vadd.f32 %v677_v45, %v385_v2  ;;  %1047 = vmax.xlane.f32.xlu0 %v1046_v46  ;;  %v1878_v53 = vpop.f32.mrb[7].mxu1  ;;  %v824_v54 = vadd.f32 %v823_v47, %v385_v2  ;;  %v1888_v55 = vpop.f32.mrb[9].mxu0 }
 0x346   :  { %v1034_v56 = vsel %vm1026_vm6, -inf, %v678_v52  ;;  %v1036_v57 = vsel %vm1028_vm7, -inf, %v824_v54 }
 0x347   :  { %v750_v58 = vpop.f32.mrb[8].mxu1  ;;  %v1049_v60 = vsel %vm1039_vm3, %v1034_v56, -inf  ;;  %v969_v61 = vpop.f32.mrb[10].mxu0  ;;  %v1055_v9 = vsel %vm1039_vm3, %v1036_v57, -inf }
 0x348   :  { %v751_v63 = vadd.f32 %v750_v58, %v385_v2  ;;  %1050 = vmax.xlane.f32.xlu1 %v1049_v60  ;;  %v1883_v1 = vpop.f32.mrb[9].mxu1  ;;  %v970_v44 = vadd.f32 %v969_v61, %v385_v2  ;;  %v1898_v4 = vpop.f32.mrb[11].mxu0 }
 0x34a   :  { %v1035_v10 = vsel %vm1027_vm8, -inf, %v751_v63  ;;  %v1038_v14 = vsel %vm1030_vm9, -inf, %v970_v44 }
 0x34b   :  { %v896_v15 = vpop.f32.mrb[10].mxu1  ;;  %v1052_v16 = vsel %vm1039_vm3, %v1035_v10, -inf  ;;  %v1061_v20 = vsel %vm1039_vm3, %v1038_v14, -inf }
 0x34c   :  { %v897_v18 = vadd.f32 %v896_v15, %v385_v2  ;;  %1056 = vmax.xlane.f32.xlu1 %v1055_v9  ;;  %1053 = vmax.xlane.f32.xlu0 %v1052_v16  ;;  %v1893_v19 = vpop.f32.mrb[11].mxu1 }
 0x34e   :  { %v1037_v51 = vsel %vm1029_vm10, -inf, %v897_v18 }
 0x34f   :  { %v1058_v21 = vsel %vm1039_vm3, %v1037_v51, -inf }
 0x350   :  { %1062 = vmax.xlane.f32.xlu1 %v1061_v20  ;;  %1059 = vmax.xlane.f32.xlu0 %v1058_v21 }
 0x3c9   :  { %v1042_v22 = vpop.xlane.xlu0 %1041 }
 0x3ca   :  { %v1064_v3 = vsub.f32 %v1031_v31, %v1042_v22 }
 0x3cc   :  { %v1072_v43 = vmul.f32 1.442695, %v1064_v3 }
 0x3cd   :  { %v1045_v24 = vpop.xlane.xlu1 %1044 }
 0x3ce   :  { %1985 = vpow2.f32 %v1072_v43  ;;  %v1065_v25 = vsub.f32 %v1032_v37, %v1045_v24 }
 0x3d0   :  { %v1074_v26 = vmul.f32 1.442695, %v1065_v25 }
 0x3d1   :  { %v1048_v50 = vpop.xlane.xlu0 %1047 }
 0x3d2   :  { %1987 = vpow2.f32 %v1074_v26  ;;  %v1066_v2 = vsub.f32 %v1033_v42, %v1048_v50 }
 0x3d4   :  { %v1076_v27 = vmul.f32 1.442695, %v1066_v2 }
 0x3d5   :  { %v1051_v28 = vpop.xlane.xlu1 %1050 }
 0x3d6   :  { %1989 = vpow2.f32 %v1076_v27  ;;  %v1067_v29 = vsub.f32 %v1034_v56, %v1051_v28 }
 0x3d8   :  { %v1986_v59 = vpop.eup %1985  ;;  %v1078_v30 = vmul.f32 1.442695, %v1067_v29 }
 0x3d9   :  { %v1057_v32 = vpop.xlane.xlu1 %1056  ;;  %v1054_v33 = vpop.xlane.xlu0 %1053  ;;  %v1088_v34 = vsel %vm1039_vm3, %v1986_v59, 0.0 }
 0x3da   :  { %1991 = vpow2.f32 %v1078_v30  ;;  %v1069_v31 = vsub.f32 %v1036_v57, %v1057_v32  ;;  %v1068_v35 = vsub.f32 %v1035_v10, %v1054_v33  ;;  %1089 = vadd.xlane.f32.xlu0 %v1088_v34 }
 0x3dc   :  { %v1988_v0 = vpop.eup %1987  ;;  %v1082_v36 = vmul.f32 1.442695, %v1069_v31  ;;  %v1080_v37 = vmul.f32 1.442695, %v1068_v35 }
 0x3dd   :  { %v1063_v13 = vpop.xlane.xlu1 %1062  ;;  %v1060_v38 = vpop.xlane.xlu0 %1059  ;;  %v1091_v39 = vsel %vm1039_vm3, %v1988_v0, 0.0 }
 0x3de   :  { %1993 = vpow2.f32 %v1082_v36  ;;  %v1071_v40 = vsub.f32 %v1038_v14, %v1063_v13  ;;  %v1070_v41 = vsub.f32 %v1037_v51, %v1060_v38  ;;  %1092 = vadd.xlane.f32.xlu1 %v1091_v39 }
 0x3df   :  { %1995 = vpow2.f32 %v1080_v37 }
 0x3e0   :  { %v1990_v17 = vpop.eup %1989  ;;  %v1086_v42 = vmul.f32 1.442695, %v1071_v40  ;;  %v1084_v45 = vmul.f32 1.442695, %v1070_v41 }
 0x3e1   :  { %v1094_v46 = vsel %vm1039_vm3, %v1990_v17, 0.0 }
 0x3e2   :  { %1997 = vpow2.f32 %v1086_v42  ;;  %1095 = vadd.xlane.f32.xlu0 %v1094_v46 }
 0x3e3   :  { %1999 = vpow2.f32 %v1084_v45 }
 0x3e4   :  { %v1992_v47 = vpop.eup %1991 }
 0x3e5   :  { %v1097_v48 = vsel %vm1039_vm3, %v1992_v47, 0.0 }
 0x3e6   :  { %1098 = vadd.xlane.f32.xlu1 %v1097_v48 }
 0x3e8   :  { %v1994_v49 = vpop.eup %1993 }
 0x3e9   :  { %v1996_v52 = vpop.eup %1995  ;;  %v1103_v53 = vsel %vm1039_vm3, %v1994_v49, 0.0 }
 0x3ea   :  { %1104 = vadd.xlane.f32.xlu1 %v1103_v53  ;;  %v1100_v54 = vsel %vm1039_vm3, %v1996_v52, 0.0 }
 0x3eb   :  { %1101 = vadd.xlane.f32.xlu0 %v1100_v54 }
 0x3ec   :  { %v1998_v55 = vpop.eup %1997 }
 0x3ed   :  { %v2000_v56 = vpop.eup %1999  ;;  %v1109_v57 = vsel %vm1039_vm3, %v1998_v55, 0.0 }
 0x3ee   :  { %1110 = vadd.xlane.f32.xlu1 %v1109_v57  ;;  %v1106_v58 = vsel %vm1039_vm3, %v2000_v56, 0.0  ;;  %vm1748_vm3 = vcmask 1047559  }
 0x3ef   :  { %1107 = vadd.xlane.f32.xlu0 %v1106_v58 }
 0x467   :  { %v1090_v60 = vpop.xlane.xlu0 %1089 }
 0x468   :  { %2001 = vrcp.f32 %v1090_v60 }
 0x46b   :  { %v1093_v61 = vpop.xlane.xlu1 %1092 }
 0x46c   :  { %2003 = vrcp.f32 %v1093_v61 }
 0x46f   :  { %v1096_v62 = vpop.xlane.xlu0 %1095 }
 0x470   :  { %2005 = vrcp.f32 %v1096_v62 }
 0x472   :  { %v2002_v63 = vpop.eup %2001 }
 0x473   :  { %v1113_v1 = vmul.f32 %v2002_v63, %v1986_v59  ;;  %v1099_v44 = vpop.xlane.xlu1 %1098 }
 0x474   :  { %2007 = vrcp.f32 %v1099_v44 }
 0x475   :  { %1902 = vmatmul.mubr.msk.f32.vlgmr.msra.gmra.mrb[12].mxu1 %vm1136_vm11, %v1113_v1 }
 0x476   :  { %v2004_v4 = vpop.eup %2003  ;;  %1910 = vmatpush3.msra.mxu1 %v2216_v5  ;;  %1911 = vmatprep.mubr.msk.f32.mxu1 %vm2119_vm1, %v2118_v23 }
 0x477   :  { %v1115_v9 = vmul.f32 %v2004_v4, %v1988_v0  ;;  %v1105_v10 = vpop.xlane.xlu1 %1104  ;;  %1919 = vmatprep.subr.mxu1 %v2118_v23 }
 0x478   :  { %2009 = vrcp.f32 %v1105_v10  ;;  %v1102_v14 = vpop.xlane.xlu0 %1101 }
 0x479   :  { %2011 = vrcp.f32 %v1102_v14  ;;  %1907 = vmatmul.mubr.msk.f32.vlgmr.msra.gmra.mrb[12].mxu0 %vm1136_vm11, %v1115_v9 }
 0x47a   :  { %v2006_v15 = vpop.eup %2005  ;;  %1915 = vmatpush3.msra.mxu0 %v2218_v6  ;;  %1916 = vmatprep.mubr.msk.f32.mxu0 %vm2119_vm1, %v2118_v23 }
 0x47b   :  { %v1117_v16 = vmul.f32 %v2006_v15, %v1990_v17  ;;  %v1111_v5 = vpop.xlane.xlu1 %1110  ;;  %1924 = vmatprep.subr.mxu0 %v2118_v23 }
 0x47c   :  { %2013 = vrcp.f32 %v1111_v5  ;;  %v1108_v18 = vpop.xlane.xlu0 %1107 }
 0x47d   :  { %2015 = vrcp.f32 %v1108_v18  ;;  %1912 = vmatmul.mubr.msk.f32.vlgmr.msra.gmra.mrb[14].mxu1 %vm1136_vm11, %v1117_v16 }
 0x47e   :  { %v2008_v19 = vpop.eup %2007  ;;  %1920 = vmatpush3.msra.mxu1 %v2220_v7  ;;  %1921 = vmatprep.mubr.msk.f32.mxu1 %vm2119_vm1, %v2118_v23 }
 0x47f   :  { %v1119_v20 = vmul.f32 %v2008_v19, %v1992_v47  ;;  %1929 = vmatprep.subr.mxu1 %v2118_v23 }
 0x481   :  { %1917 = vmatmul.mubr.msk.f32.vlgmr.msra.gmra.mrb[14].mxu0 %vm1136_vm11, %v1119_v20 }
 0x482   :  { %v2010_v6 = vpop.eup %2009  ;;  %1925 = vmatpush3.msra.mxu0 %v2222_v8  ;;  %1926 = vmatprep.mubr.msk.f32.mxu0 %vm2119_vm1, %v2118_v23 }
 0x483   :  { %v2012_v51 = vpop.eup %2011  ;;  %v1123_v21 = vmul.f32 %v2010_v6, %v1994_v49  ;;  %1934 = vmatprep.subr.mxu0 %v2118_v23 }
 0x484   :  { %v1121_v22 = vmul.f32 %v2012_v51, %v1996_v52 }
 0x485   :  { %1927 = vmatmul.mubr.msk.f32.vlgmr.msra.gmra.mrb[16].mxu0 %vm1136_vm11, %v1123_v21 }
 0x486   :  { %v2014_v7 = vpop.eup %2013  ;;  %1922 = vmatmul.mubr.msk.f32.vlgmr.msra.gmra.mrb[16].mxu1 %vm1136_vm11, %v1121_v22  ;;  %1935 = vmatpush3.msra.mxu0 %v2233_v12 }
 0x487   :  { %v2016_v3 = vpop.eup %2015  ;;  %v1127_v43 = vmul.f32 %v2014_v7, %v1998_v55  ;;  %1930 = vmatpush3.msra.mxu1 %v2231_v11  ;;  %1931 = vmatprep.mubr.msk.f32.mxu1 %vm2119_vm1, %v2118_v23 }
 0x488   :  { %v1125_v8 = vmul.f32 %v2016_v3, %v2000_v56  ;;  %1936 = vmatprep.mubr.msk.f32.mxu0 %vm2119_vm1, %v2118_v23  ;;  %vm1742_vm1 = vcmask 1045509  }
 0x489   :  { %1937 = vmatmul.mubr.msk.f32.vlgmr.msra.gmra.mrb[18].mxu0 %vm1136_vm11, %v1127_v43 }
 0x48a   :  { %1932 = vmatmul.mubr.msk.f32.vlgmr.msra.gmra.mrb[18].mxu1 %vm1136_vm11, %v1125_v8 }
 0x548   :  { %v1206_v24 = vpop.f32.mrb[12].mxu1 }
 0x549   :  { %v1903_v25 = vpop.f32.mrb[13].mxu1 }
 0x54c   :  { %v1279_v26 = vpop.f32.mrb[12].mxu0 }
 0x54d   :  { %v1729_v12 = vrot.slane %v1279_v26, 7  ;;  %v1908_v50 = vpop.f32.mrb[13].mxu0 }
 0x54f   :  { %v1731_v2 = vsel %vm1730_vm12, %v1729_v12, %v1206_v24 }
 0x550   :  { %v1352_v27 = vpop.f32.mrb[14].mxu1 }
 0x551   :  { %v1732_v11 = vrot.slane %v1352_v27, 6  ;;  %v1913_v28 = vpop.f32.mrb[15].mxu1 }
 0x553   :  { %v1734_v29 = vsel %vm1733_vm13, %v1732_v11, %v1731_v2 }
 0x554   :  { %v1425_v59 = vpop.f32.mrb[14].mxu0 }
 0x555   :  { %v1735_v30 = vrot.slane %v1425_v59, 5  ;;  %v1918_v23 = vpop.f32.mrb[15].mxu0 }
 0x557   :  { %v1737_v32 = vsel %vm1736_vm14, %v1735_v30, %v1734_v29 }
 0x558   :  { %v1571_v33 = vpop.f32.mrb[16].mxu0 }
 0x559   :  { %v1498_v34 = vpop.f32.mrb[16].mxu1  ;;  %v1741_v31 = vrot.slane %v1571_v33, 3  ;;  %v1928_v35 = vpop.f32.mrb[17].mxu0 }
 0x55a   :  { %v1738_v0 = vrot.slane %v1498_v34, 4  ;;  %v1923_v36 = vpop.f32.mrb[17].mxu1 }
 0x55c   :  { %v1740_v37 = vsel %vm1739_vm15, %v1738_v0, %v1737_v32  ;;  %v1717_v13 = vpop.f32.mrb[18].mxu0 }
 0x55d   :  { %v1743_v38 = vsel %vm1742_vm1, %v1741_v31, %v1740_v37  ;;  %v1644_v39 = vpop.f32.mrb[18].mxu1  ;;  %v1747_v40 = vrot.slane %v1717_v13, 1  ;;  %v1938_v41 = vpop.f32.mrb[19].mxu0 }
 0x55e   :  { %v1744_v17 = vrot.slane %v1644_v39, 2  ;;  %v1933_v42 = vpop.f32.mrb[19].mxu1 }
 0x560   :  { %v1746_v45 = vsel %vm1745_vm2, %v1744_v17, %v1743_v38 }
 0x561   :  { %v1749_v46 = vsel %vm1748_vm3, %v1747_v40, %v1746_v45 }
 0x562   :  { %1751 = vst.msk [vmem:[#allocation9] sm:$0xff] %vm134_vm0, %v1749_v46 }
 0x563   :  { %2094 = shalt.err (!%p2091_p0)
}
 0x564   :  { %s2095_s29 = scalar_lea.hbm %s2426_s8, 128 }
 0x565   :  { %p2096_p1 = scmp.ne.s32.totalorder %s2426_s8, %s2095_s29  ;;  %p2099_p2 = scmp.lt.u32.totalorder %s2095_s29, %s2426_s8 }
 0x567   :  { %p2101_p3 = pnand %p2099_p2, %p2096_p1 }
 0x569   :  { %2104 = shalt.err (!%p2101_p3)
}
 0x56a   :  { %1761 = dma.vmem_to_hbm [thread:$0]  %s1759_s26, 128, %s2426_s8, [#allocation5]  }
 0x56b   :  { %2109 = dma.done.wait [#allocation5], 128  }
 0x56c   :  { %2110 = vsyncadd [#allocation5], 4294967168 }
 0x56d   :  { %1765 = vsyncpa [#allocation4], 1 }
 0x56e   :  { %1766 = vsyncpa [#allocation7], 1 }
 0x56f   :  { %1767 = vsyncpa [#allocation5], 1 }

</bundles_post_ra>
